<compile_context>
chip_gen: v6e
topology: v6e:2x2x1
jax: 0.10.0
libtpu: 0.0.40
codegen_flags: <defaults>
</compile_context>

<pallas_src>
import functools

import jax
import jax.numpy as jnp
from jax.experimental import pallas as pl
from jax.experimental.pallas import tpu as pltpu


def _round_up(x, m):
    return (x + m - 1) // m * m


def mapping_kernel(x_ref, w1t_ref, b1_ref, wst_ref, bs_ref, out_ref,
                   *, z_dim, n_hidden, mxu_dtype):
    # ---- PixelNorm over the ORIGINAL z_dim features (padded lanes are zero,
    #      so sum over the padded axis == sum over the real features; divide by
    #      the true z_dim, not the padded width). Done in f32 on the VPU. ----
    x = x_ref[...].astype(jnp.float32)
    mean_sq = jnp.sum(x * x, axis=1, keepdims=True) * (1.0 / z_dim)
    x = x / jnp.sqrt(mean_sq + 1e-8)

    # ---- Layer 1 (z_dim -> w_dim). sqrt(2/z_dim) is pre-folded into w1t. ----
    h = jnp.dot(x.astype(mxu_dtype), w1t_ref[...],
                preferred_element_type=jnp.float32) + b1_ref[...]
    h = jnp.maximum(h, 0.0)

    # ---- Layers 2..8 (w_dim -> w_dim). sqrt(2/w_dim) pre-folded into wst.
    #      ReLU after all but the last layer. ----
    for i in range(n_hidden):
        h = jnp.dot(h.astype(mxu_dtype), wst_ref[i],
                    preferred_element_type=jnp.float32) + bs_ref[i]
        if i < n_hidden - 1:
            h = jnp.maximum(h, 0.0)

    out_ref[...] = h.astype(out_ref.dtype)


def mapping_network(x, w1, b1, ws, bs, *, mxu_dtype=None, block_b=256):
    """x: (B, z_dim); w1: (w_dim, z_dim); b1: (w_dim,);
    ws: (7, w_dim, w_dim); bs: (7, w_dim).  Returns (B, w_dim).

    mxu_dtype: dtype used for the matmul operands (e.g. jnp.bfloat16 on
    v6e/v7x); accumulation and all elementwise math stay f32.
    """
    B, z_dim = x.shape
    w_dim = w1.shape[0]
    n_hidden = ws.shape[0]
    if mxu_dtype is None:
        mxu_dtype = x.dtype
    mxu_dtype = jnp.dtype(mxu_dtype)

    # Fold equalized-LR scale into the pre-transposed (in, out) weights.
    w1t = jnp.transpose(w1) * jnp.float32((2.0 / z_dim) ** 0.5)       # (z_dim, w_dim)
    wst = jnp.transpose(ws, (0, 2, 1)) * jnp.float32((2.0 / w_dim) ** 0.5)

    # Lane-dense padding: features -> multiple of 128, batch -> multiple of TB.
    Zp = _round_up(z_dim, 128)
    Wp = _round_up(w_dim, 128)
    TB = min(_round_up(B, 8), _round_up(block_b, 8))   # sublane-aligned batch tile
    Bp = _round_up(B, TB)

    x_p = jnp.zeros((Bp, Zp), jnp.float32).at[:B, :z_dim].set(x.astype(jnp.float32))
    w1t_p = jnp.zeros((Zp, Wp), mxu_dtype).at[:z_dim, :w_dim].set(w1t.astype(mxu_dtype))
    wst_p = (jnp.zeros((n_hidden, Wp, Wp), mxu_dtype)
             .at[:, :w_dim, :w_dim].set(wst.astype(mxu_dtype)))
    b1_p = jnp.zeros((1, Wp), jnp.float32).at[0, :w_dim].set(b1.astype(jnp.float32))
    bs_p = (jnp.zeros((n_hidden, 1, Wp), jnp.float32)
            .at[:, 0, :w_dim].set(bs.astype(jnp.float32)))

    grid = (Bp // TB,)

    kernel = functools.partial(
        mapping_kernel, z_dim=z_dim, n_hidden=n_hidden, mxu_dtype=mxu_dtype)

    # Explicit VMEM budget: resident weights (x2 buffers), double-buffered
    # x/out tiles, live f32 intermediates, plus slack. Clamp to [32, 64] MiB
    # so it stays safe on v7x's 64 MiB per-TC VMEM.
    out_itemsize = jnp.dtype(x.dtype).itemsize
    wbytes = ((Zp * Wp + n_hidden * Wp * Wp) * mxu_dtype.itemsize
              + (n_hidden + 1) * Wp * 4)
    tbytes = TB * Zp * 4 + TB * Wp * out_itemsize
    vmem_limit = 2 * wbytes + 2 * tbytes + 4 * TB * Wp * 4 + (4 << 20)
    vmem_limit = int(min(max(vmem_limit, 32 << 20), 64 << 20))

    out_p = pl.pallas_call(
        kernel,
        out_shape=jax.ShapeDtypeStruct((Bp, Wp), x.dtype),
        grid_spec=pltpu.PrefetchScalarGridSpec(
            num_scalar_prefetch=0,
            grid=grid,
            in_specs=[
                pl.BlockSpec((TB, Zp), lambda i: (i, 0)),              # x tile (pipelined)
                pl.BlockSpec((Zp, Wp), lambda i: (0, 0)),              # resident weights
                pl.BlockSpec((1, Wp), lambda i: (0, 0)),
                pl.BlockSpec((n_hidden, Wp, Wp), lambda i: (0, 0, 0)),
                pl.BlockSpec((n_hidden, 1, Wp), lambda i: (0, 0, 0)),
            ],
            out_specs=pl.BlockSpec((TB, Wp), lambda i: (i, 0)),        # out tile (pipelined)
        ),
        compiler_params=pltpu.CompilerParams(
            dimension_semantics=("parallel",),     # megacore sharding on v7x
            vmem_limit_bytes=vmem_limit,
        ),
    )(x_p, w1t_p, b1_p, wst_p, bs_p)

    return out_p[:B, :w_dim]


def mapping_network_ref(x, w1, b1, ws, bs):
    """Pure-JAX reference matching the PyTorch module."""
    z_dim = x.shape[1]
    w_dim = w1.shape[0]
    h = x / jnp.sqrt(jnp.mean(x * x, axis=1, keepdims=True) + 1e-8)
    h = (h * (2.0 / z_dim) ** 0.5) @ w1.T + b1
    h = jnp.maximum(h, 0.0)
    for i in range(ws.shape[0]):
        h = (h * (2.0 / w_dim) ** 0.5) @ ws[i].T + bs[i]
        if i < ws.shape[0] - 1:
            h = jnp.maximum(h, 0.0)
    return h


if __name__ == "__main__":
    B, z_dim, w_dim = 8, 64, 32

    key = jax.random.PRNGKey(0)
    kx, k1, kh = jax.random.split(key, 3)

    x = jax.random.normal(kx, (B, z_dim), dtype=jnp.float32)

    # Parameters per nn.init in the module: weights ~ N(0,1), biases zero.
    w1 = jax.random.normal(k1, (w_dim, z_dim), dtype=jnp.float32)
    b1 = jnp.zeros((w_dim,), dtype=jnp.float32)
    ws = jax.random.normal(kh, (7, w_dim, w_dim), dtype=jnp.float32)
    bs = jnp.zeros((7, w_dim), dtype=jnp.float32)

    ref = mapping_network_ref(x, w1, b1, ws, bs)

    # f32 MXU path (default).
    out = jax.block_until_ready(mapping_network(x, w1, b1, ws, bs))
    assert out.shape == (B, w_dim)
    assert jnp.allclose(out, ref, rtol=2e-3, atol=2e-3), "f32 kernel mismatch vs reference"

    # bf16 MXU operands (recommended on v6e/v7x); loose sanity check only.
    out_bf16 = jax.block_until_ready(
        mapping_network(x, w1, b1, ws, bs, mxu_dtype=jnp.bfloat16))
    assert out_bf16.shape == (B, w_dim)
    assert bool(jnp.all(jnp.isfinite(out_bf16)))
    max_err = jnp.max(jnp.abs(out_bf16 - ref))
    assert max_err < 0.1 * (jnp.max(jnp.abs(ref)) + 1.0), "bf16 kernel sanity check failed"

    print("KERNEL_OK")
</pallas_src>

<mosaic_0001>
module attributes {stable_mosaic.version = 11 : i64} {
  func.func @mapping_kernel(%arg0: i32, %arg1: memref<8x128xf32, #tpu.memory_space<vmem>>, %arg2: memref<128x128xf32, #tpu.memory_space<vmem>>, %arg3: memref<1x128xf32, #tpu.memory_space<vmem>>, %arg4: memref<7x128x128xf32, #tpu.memory_space<vmem>>, %arg5: memref<7x1x128xf32, #tpu.memory_space<vmem>>, %arg6: memref<8x128xf32, #tpu.memory_space<vmem>>) attributes {dimension_semantics = [#tpu.dimension_semantics<parallel>], iteration_bounds = array<i64: 1>, scalar_prefetch = 0 : i64, scratch_operands = 0 : i64, tpu.core_type = #tpu.core_type<tc>, window_params = [{transform_indices = @transform_0, window_bounds = array<i64: 8, 128>}, {pipeline_mode = #tpu.pipeline_mode<synchronous>, transform_indices = @transform_1, window_bounds = array<i64: 128, 128>}, {pipeline_mode = #tpu.pipeline_mode<synchronous>, transform_indices = @transform_2, window_bounds = array<i64: 1, 128>}, {pipeline_mode = #tpu.pipeline_mode<synchronous>, transform_indices = @transform_3, window_bounds = array<i64: 7, 128, 128>}, {pipeline_mode = #tpu.pipeline_mode<synchronous>, transform_indices = @transform_4, window_bounds = array<i64: 7, 1, 128>}, {transform_indices = @transform_5, window_bounds = array<i64: 8, 128>}]} {
    %c0 = arith.constant 0 : index
    %c0_0 = arith.constant 0 : index
    %0 = vector.load %arg1[%c0, %c0_0] : memref<8x128xf32, #tpu.memory_space<vmem>>, vector<8x128xf32>
    %1 = arith.mulf %0, %0 : vector<8x128xf32>
    %cst = arith.constant dense<0.000000e+00> : vector<8xf32>
    %2 = vector.multi_reduction <add>, %1, %cst [1] : vector<8x128xf32> to vector<8xf32>
    %3 = vector.shape_cast %2 : vector<8xf32> to vector<8x1xf32>
    %cst_1 = arith.constant 1.562500e-02 : f32
    %4 = vector.broadcast %cst_1 : f32 to vector<8x1xf32>
    %5 = arith.mulf %3, %4 : vector<8x1xf32>
    %cst_2 = arith.constant 9.99999993E-9 : f32
    %6 = vector.broadcast %cst_2 : f32 to vector<8x1xf32>
    %7 = arith.addf %5, %6 : vector<8x1xf32>
    %8 = math.sqrt %7 : vector<8x1xf32>
    %9 = vector.broadcast %8 : vector<8x1xf32> to vector<8x128xf32>
    %10 = arith.divf %0, %9 : vector<8x128xf32>
    %c0_3 = arith.constant 0 : index
    %c0_4 = arith.constant 0 : index
    %11 = vector.load %arg2[%c0_3, %c0_4] : memref<128x128xf32, #tpu.memory_space<vmem>>, vector<128x128xf32>
    %cst_5 = arith.constant dense<0.000000e+00> : vector<8x128xf32>
    %12 = tpu.matmul %10, %11, %cst_5 {dimension_numbers = #tpu.dot_dimension_numbers<[1], [0], [0], [1], [0, 0, 1, 1], [], []>} : vector<8x128xf32>, vector<128x128xf32>, vector<8x128xf32> -> vector<8x128xf32>
    %c0_6 = arith.constant 0 : index
    %c0_7 = arith.constant 0 : index
    %13 = vector.load %arg3[%c0_6, %c0_7] : memref<1x128xf32, #tpu.memory_space<vmem>>, vector<1x128xf32>
    %14 = vector.broadcast %13 : vector<1x128xf32> to vector<8x128xf32>
    %15 = arith.addf %12, %14 : vector<8x128xf32>
    %cst_8 = arith.constant 0.000000e+00 : f32
    %16 = vector.broadcast %cst_8 : f32 to vector<8x128xf32>
    %17 = arith.maximumf %15, %16 : vector<8x128xf32>
    %c0_9 = arith.constant 0 : index
    %c0_10 = arith.constant 0 : index
    %c0_11 = arith.constant 0 : index
    %18 = vector.load %arg4[%c0_9, %c0_10, %c0_11] : memref<7x128x128xf32, #tpu.memory_space<vmem>>, vector<1x128x128xf32>
    %19 = vector.shape_cast %18 : vector<1x128x128xf32> to vector<128x128xf32>
    %cst_12 = arith.constant dense<0.000000e+00> : vector<8x128xf32>
    %20 = tpu.matmul %17, %19, %cst_12 {dimension_numbers = #tpu.dot_dimension_numbers<[1], [0], [0], [1], [0, 0, 1, 1], [], []>} : vector<8x128xf32>, vector<128x128xf32>, vector<8x128xf32> -> vector<8x128xf32>
    %c0_13 = arith.constant 0 : index
    %c0_14 = arith.constant 0 : index
    %c0_15 = arith.constant 0 : index
    %21 = vector.load %arg5[%c0_13, %c0_14, %c0_15] : memref<7x1x128xf32, #tpu.memory_space<vmem>>, vector<1x1x128xf32>
    %22 = vector.shape_cast %21 : vector<1x1x128xf32> to vector<1x128xf32>
    %23 = vector.broadcast %22 : vector<1x128xf32> to vector<8x128xf32>
    %24 = arith.addf %20, %23 : vector<8x128xf32>
    %cst_16 = arith.constant 0.000000e+00 : f32
    %25 = vector.broadcast %cst_16 : f32 to vector<8x128xf32>
    %26 = arith.maximumf %24, %25 : vector<8x128xf32>
    %c1 = arith.constant 1 : index
    %c0_17 = arith.constant 0 : index
    %c0_18 = arith.constant 0 : index
    %27 = vector.load %arg4[%c1, %c0_17, %c0_18] : memref<7x128x128xf32, #tpu.memory_space<vmem>>, vector<1x128x128xf32>
    %28 = vector.shape_cast %27 : vector<1x128x128xf32> to vector<128x128xf32>
    %cst_19 = arith.constant dense<0.000000e+00> : vector<8x128xf32>
    %29 = tpu.matmul %26, %28, %cst_19 {dimension_numbers = #tpu.dot_dimension_numbers<[1], [0], [0], [1], [0, 0, 1, 1], [], []>} : vector<8x128xf32>, vector<128x128xf32>, vector<8x128xf32> -> vector<8x128xf32>
    %c1_20 = arith.constant 1 : index
    %c0_21 = arith.constant 0 : index
    %c0_22 = arith.constant 0 : index
    %30 = vector.load %arg5[%c1_20, %c0_21, %c0_22] : memref<7x1x128xf32, #tpu.memory_space<vmem>>, vector<1x1x128xf32>
    %31 = vector.shape_cast %30 : vector<1x1x128xf32> to vector<1x128xf32>
    %32 = vector.broadcast %31 : vector<1x128xf32> to vector<8x128xf32>
    %33 = arith.addf %29, %32 : vector<8x128xf32>
    %cst_23 = arith.constant 0.000000e+00 : f32
    %34 = vector.broadcast %cst_23 : f32 to vector<8x128xf32>
    %35 = arith.maximumf %33, %34 : vector<8x128xf32>
    %c2 = arith.constant 2 : index
    %c0_24 = arith.constant 0 : index
    %c0_25 = arith.constant 0 : index
    %36 = vector.load %arg4[%c2, %c0_24, %c0_25] : memref<7x128x128xf32, #tpu.memory_space<vmem>>, vector<1x128x128xf32>
    %37 = vector.shape_cast %36 : vector<1x128x128xf32> to vector<128x128xf32>
    %cst_26 = arith.constant dense<0.000000e+00> : vector<8x128xf32>
    %38 = tpu.matmul %35, %37, %cst_26 {dimension_numbers = #tpu.dot_dimension_numbers<[1], [0], [0], [1], [0, 0, 1, 1], [], []>} : vector<8x128xf32>, vector<128x128xf32>, vector<8x128xf32> -> vector<8x128xf32>
    %c2_27 = arith.constant 2 : index
    %c0_28 = arith.constant 0 : index
    %c0_29 = arith.constant 0 : index
    %39 = vector.load %arg5[%c2_27, %c0_28, %c0_29] : memref<7x1x128xf32, #tpu.memory_space<vmem>>, vector<1x1x128xf32>
    %40 = vector.shape_cast %39 : vector<1x1x128xf32> to vector<1x128xf32>
    %41 = vector.broadcast %40 : vector<1x128xf32> to vector<8x128xf32>
    %42 = arith.addf %38, %41 : vector<8x128xf32>
    %cst_30 = arith.constant 0.000000e+00 : f32
    %43 = vector.broadcast %cst_30 : f32 to vector<8x128xf32>
    %44 = arith.maximumf %42, %43 : vector<8x128xf32>
    %c3 = arith.constant 3 : index
    %c0_31 = arith.constant 0 : index
    %c0_32 = arith.constant 0 : index
    %45 = vector.load %arg4[%c3, %c0_31, %c0_32] : memref<7x128x128xf32, #tpu.memory_space<vmem>>, vector<1x128x128xf32>
    %46 = vector.shape_cast %45 : vector<1x128x128xf32> to vector<128x128xf32>
    %cst_33 = arith.constant dense<0.000000e+00> : vector<8x128xf32>
    %47 = tpu.matmul %44, %46, %cst_33 {dimension_numbers = #tpu.dot_dimension_numbers<[1], [0], [0], [1], [0, 0, 1, 1], [], []>} : vector<8x128xf32>, vector<128x128xf32>, vector<8x128xf32> -> vector<8x128xf32>
    %c3_34 = arith.constant 3 : index
    %c0_35 = arith.constant 0 : index
    %c0_36 = arith.constant 0 : index
    %48 = vector.load %arg5[%c3_34, %c0_35, %c0_36] : memref<7x1x128xf32, #tpu.memory_space<vmem>>, vector<1x1x128xf32>
    %49 = vector.shape_cast %48 : vector<1x1x128xf32> to vector<1x128xf32>
    %50 = vector.broadcast %49 : vector<1x128xf32> to vector<8x128xf32>
    %51 = arith.addf %47, %50 : vector<8x128xf32>
    %cst_37 = arith.constant 0.000000e+00 : f32
    %52 = vector.broadcast %cst_37 : f32 to vector<8x128xf32>
    %53 = arith.maximumf %51, %52 : vector<8x128xf32>
    %c4 = arith.constant 4 : index
    %c0_38 = arith.constant 0 : index
    %c0_39 = arith.constant 0 : index
    %54 = vector.load %arg4[%c4, %c0_38, %c0_39] : memref<7x128x128xf32, #tpu.memory_space<vmem>>, vector<1x128x128xf32>
    %55 = vector.shape_cast %54 : vector<1x128x128xf32> to vector<128x128xf32>
    %cst_40 = arith.constant dense<0.000000e+00> : vector<8x128xf32>
    %56 = tpu.matmul %53, %55, %cst_40 {dimension_numbers = #tpu.dot_dimension_numbers<[1], [0], [0], [1], [0, 0, 1, 1], [], []>} : vector<8x128xf32>, vector<128x128xf32>, vector<8x128xf32> -> vector<8x128xf32>
    %c4_41 = arith.constant 4 : index
    %c0_42 = arith.constant 0 : index
    %c0_43 = arith.constant 0 : index
    %57 = vector.load %arg5[%c4_41, %c0_42, %c0_43] : memref<7x1x128xf32, #tpu.memory_space<vmem>>, vector<1x1x128xf32>
    %58 = vector.shape_cast %57 : vector<1x1x128xf32> to vector<1x128xf32>
    %59 = vector.broadcast %58 : vector<1x128xf32> to vector<8x128xf32>
    %60 = arith.addf %56, %59 : vector<8x128xf32>
    %cst_44 = arith.constant 0.000000e+00 : f32
    %61 = vector.broadcast %cst_44 : f32 to vector<8x128xf32>
    %62 = arith.maximumf %60, %61 : vector<8x128xf32>
    %c5 = arith.constant 5 : index
    %c0_45 = arith.constant 0 : index
    %c0_46 = arith.constant 0 : index
    %63 = vector.load %arg4[%c5, %c0_45, %c0_46] : memref<7x128x128xf32, #tpu.memory_space<vmem>>, vector<1x128x128xf32>
    %64 = vector.shape_cast %63 : vector<1x128x128xf32> to vector<128x128xf32>
    %cst_47 = arith.constant dense<0.000000e+00> : vector<8x128xf32>
    %65 = tpu.matmul %62, %64, %cst_47 {dimension_numbers = #tpu.dot_dimension_numbers<[1], [0], [0], [1], [0, 0, 1, 1], [], []>} : vector<8x128xf32>, vector<128x128xf32>, vector<8x128xf32> -> vector<8x128xf32>
    %c5_48 = arith.constant 5 : index
    %c0_49 = arith.constant 0 : index
    %c0_50 = arith.constant 0 : index
    %66 = vector.load %arg5[%c5_48, %c0_49, %c0_50] : memref<7x1x128xf32, #tpu.memory_space<vmem>>, vector<1x1x128xf32>
    %67 = vector.shape_cast %66 : vector<1x1x128xf32> to vector<1x128xf32>
    %68 = vector.broadcast %67 : vector<1x128xf32> to vector<8x128xf32>
    %69 = arith.addf %65, %68 : vector<8x128xf32>
    %cst_51 = arith.constant 0.000000e+00 : f32
    %70 = vector.broadcast %cst_51 : f32 to vector<8x128xf32>
    %71 = arith.maximumf %69, %70 : vector<8x128xf32>
    %c6 = arith.constant 6 : index
    %c0_52 = arith.constant 0 : index
    %c0_53 = arith.constant 0 : index
    %72 = vector.load %arg4[%c6, %c0_52, %c0_53] : memref<7x128x128xf32, #tpu.memory_space<vmem>>, vector<1x128x128xf32>
    %73 = vector.shape_cast %72 : vector<1x128x128xf32> to vector<128x128xf32>
    %cst_54 = arith.constant dense<0.000000e+00> : vector<8x128xf32>
    %74 = tpu.matmul %71, %73, %cst_54 {dimension_numbers = #tpu.dot_dimension_numbers<[1], [0], [0], [1], [0, 0, 1, 1], [], []>} : vector<8x128xf32>, vector<128x128xf32>, vector<8x128xf32> -> vector<8x128xf32>
    %c6_55 = arith.constant 6 : index
    %c0_56 = arith.constant 0 : index
    %c0_57 = arith.constant 0 : index
    %75 = vector.load %arg5[%c6_55, %c0_56, %c0_57] : memref<7x1x128xf32, #tpu.memory_space<vmem>>, vector<1x1x128xf32>
    %76 = vector.shape_cast %75 : vector<1x1x128xf32> to vector<1x128xf32>
    %77 = vector.broadcast %76 : vector<1x128xf32> to vector<8x128xf32>
    %78 = arith.addf %74, %77 : vector<8x128xf32>
    %c0_58 = arith.constant 0 : index
    %c0_59 = arith.constant 0 : index
    %79 = vector.load %arg6[%c0_58, %c0_59] : memref<8x128xf32, #tpu.memory_space<vmem>>, vector<8x128xf32>
    tpu.vector_store %arg6[%c0_58, %c0_59], %78 {strides = array<i32>} : memref<8x128xf32, #tpu.memory_space<vmem>>, vector<8x128xf32>,
    return
  }
  func.func @transform_0(%arg0: i32) -> (i32, i32) {
    %c0_i32 = arith.constant 0 : i32
    %c0_i32_0 = arith.constant 0 : i32
    return %arg0, %c0_i32 : i32, i32
  }
  func.func @transform_1(%arg0: i32) -> (i32, i32) {
    %c0_i32 = arith.constant 0 : i32
    %c0_i32_0 = arith.constant 0 : i32
    %c0_i32_1 = arith.constant 0 : i32
    return %c0_i32, %c0_i32_0 : i32, i32
  }
  func.func @transform_2(%arg0: i32) -> (i32, i32) {
    %c0_i32 = arith.constant 0 : i32
    %c0_i32_0 = arith.constant 0 : i32
    %c0_i32_1 = arith.constant 0 : i32
    return %c0_i32, %c0_i32_0 : i32, i32
  }
  func.func @transform_3(%arg0: i32) -> (i32, i32, i32) {
    %c0_i32 = arith.constant 0 : i32
    %c0_i32_0 = arith.constant 0 : i32
    %c0_i32_1 = arith.constant 0 : i32
    %c0_i32_2 = arith.constant 0 : i32
    return %c0_i32, %c0_i32_0, %c0_i32_1 : i32, i32, i32
  }
  func.func @transform_4(%arg0: i32) -> (i32, i32, i32) {
    %c0_i32 = arith.constant 0 : i32
    %c0_i32_0 = arith.constant 0 : i32
    %c0_i32_1 = arith.constant 0 : i32
    %c0_i32_2 = arith.constant 0 : i32
    return %c0_i32, %c0_i32_0, %c0_i32_1 : i32, i32, i32
  }
  func.func @transform_5(%arg0: i32) -> (i32, i32) {
    %c0_i32 = arith.constant 0 : i32
    %c0_i32_0 = arith.constant 0 : i32
    return %arg0, %c0_i32 : i32, i32
  }
}

</mosaic_0001>

<bundles_post_ra>
// kernel: tpu_custom_call.1
= control target key start
LH: loop header
LB: loop body
LE: loop exit
PB: predicated region body
PF: predicated region fallthrough
CT: control target
= control target key end

     0   :  { %10 = vsyncpa [#allocation3], 0  ;;  %s1649_s0 = inlined_call_operand.hbm [shape: f32[8,128], index: 0, kind: input, shape index: {}]   ;;  %s1650_s1 = inlined_call_operand.hbm [shape: f32[128,128], index: 1, kind: input, shape index: {}]   ;;  %s1651_s2 = inlined_call_operand.hbm [shape: f32[1,128], index: 2, kind: input, shape index: {}]   ;;  %s1652_s3 = inlined_call_operand.hbm [shape: f32[7,128,128], index: 3, kind: input, shape index: {}]   ;;  %s1653_s4 = inlined_call_operand.vmem [shape: f32[7,1,128], index: 4, kind: input, shape index: {}]   ;;  %s1654_s5 = inlined_call_operand.hbm [shape: f32[8,128], index: 5, kind: output, shape index: {}]  }
   0x1   :  { %11 = vsyncpa [#allocation6], 0 }
   0x2   :  { %12 = vsyncpa [#allocation9], 0 }
   0x3   :  { %13 = vsyncpa [#allocation4], 0  ;;  %s1419_s18 = smov [#allocation5]  }
   0x4   :  { %s29_s19 = sshll.u32 %s1419_s18, 4  ;;  %s30_s19 = int_to_ptr.vmem [resolvable:$true] %s29_s19 }
   0x5   :  { %s1319_s20 = scalar_lea.vmem %s30_s19, 2048  ;;  %p1324_p1 = scmp.lt.s32.totalorder %s30_s19, %s30_s19 }
   0x6   :  { %p1320_p0 = scmp.ne.s32.totalorder %s30_s19, %s1319_s20  ;;  %p1325_p2 = scmp.lt.s32.totalorder %s1319_s20, %s1319_s20 }
   0x8   :  { %p1326_p3 = por %p1325_p2, %p1324_p1 }
   0xa   :  { %p1327_p4 = pnand %p1326_p3, %p1320_p0 }
   0xc   :  { %1330 = shalt.err (!%p1327_p4)
}
   0xd   :  { %s1420_s21 = smov 128   ;;  %s1421_s22 = smov 8  }
   0xe   :  { %35 = dma.hbm_to_vmem [thread:$0]  %s1650_s1, 2048, %s30_s19, [#allocation6], %s1420_s21, %s1420_s21, %s1421_s22  }
   0xf   :  { %s1422_s25 = smov [#allocation2]   ;;  %s1423_s27 = smov [#allocation7]  }
  0x10   :  { %s20_s26 = sshll.u32 %s1422_s25, 4  ;;  %s42_s28 = sshll.u32 %s1423_s27, 4  ;;  %s21_s26 = int_to_ptr.vmem [resolvable:$true] %s20_s26  ;;  %s43_s28 = int_to_ptr.vmem [resolvable:$true] %s42_s28 }
  0x11   :  { %s1339_s29 = scalar_lea.vmem %s21_s26, 128  ;;  %p1344_p6 = scmp.lt.s32.totalorder %s21_s26, %s21_s26 }
  0x12   :  { %p1340_p5 = scmp.ne.s32.totalorder %s21_s26, %s1339_s29  ;;  %p1345_p7 = scmp.lt.s32.totalorder %s1339_s29, %s1339_s29 }
  0x14   :  { %p1346_p8 = por %p1345_p7, %p1344_p6 }
  0x16   :  { %p1347_p9 = pnand %p1346_p8, %p1340_p5 }
  0x18   :  { %1350 = shalt.err (!%p1347_p9)
}
  0x19   :  { %23 = dma.hbm_to_vmem [thread:$0]  %s1649_s0, 128, %s21_s26, [#allocation3]  }
  0x1a   :  { %s1359_s7 = scalar_lea.vmem %s43_s28, 16  ;;  %s1363_s1 = scalar_lea.vmem %s43_s28, 32 }
  0x1b   :  { %p1360_p10 = scmp.ne.s32.totalorder %s43_s28, %s1359_s7  ;;  %p1364_p11 = scmp.lt.s32.totalorder %s43_s28, %s43_s28 }
  0x1c   :  { %p1365_p12 = scmp.lt.s32.totalorder %s1363_s1, %s1359_s7 }
  0x1e   :  { %p1366_p13 = por %p1365_p12, %p1364_p11 }
  0x20   :  { %p1367_p0 = pnand %p1366_p13, %p1360_p10 }
  0x22   :  { %1370 = shalt.err (!%p1367_p0)
}
  0x23   :  { %45 = dma.hbm_to_vmem [thread:$0]  %s1651_s2, 16, %s43_s28, [#allocation6]  }
  0x24   :  { %s1424_s10 = smov [#allocation8]  }
  0x25   :  { %s51_s11 = sshll.u32 %s1424_s10, 4  ;;  %s52_s11 = int_to_ptr.vmem [resolvable:$true] %s51_s11 }
  0x26   :  { %s1379_s12 = scalar_lea.vmem %s52_s11, 14336  ;;  %p1384_p2 = scmp.lt.s32.totalorder %s52_s11, %s52_s11 }
  0x27   :  { %p1380_p1 = scmp.ne.s32.totalorder %s52_s11, %s1379_s12  ;;  %p1385_p3 = scmp.lt.s32.totalorder %s1379_s12, %s1379_s12 }
  0x29   :  { %p1386_p4 = por %p1385_p3, %p1384_p2 }
  0x2b   :  { %p1387_p5 = pnand %p1386_p4, %p1380_p1 }
  0x2d   :  { %1390 = shalt.err (!%p1387_p5)
}
  0x2e   :  { %57 = dma.hbm_to_vmem [thread:$0]  %s1652_s3, 14336, %s52_s11, [#allocation9], %s1420_s21, %s1420_s21, %s1421_s22  }
  0x2f   :  { %1411 = dma.done.wait [#allocation3], 128  }
  0x30   :  { %1412 = vsyncadd [#allocation3], 4294967168 }
  0x31   :  { %1413 = dma.done.wait [#allocation6], 2064  }
  0x32   :  { %1414 = vsyncadd [#allocation6], 4294965232 }
  0x33   :  { %1415 = dma.done.wait [#allocation9], 14336  }
  0x34   :  { %1416 = vsyncadd [#allocation9], 4294952960  ;;  %v1476_v0 = vld [vmem:[#allocation2] sm:$0xff]  ;;  %v1425_v2 = vmov 0.0   ;;  %v101_v4 = vld [vmem:[#allocation5 + $0x70] sm:$0xff]  ;;  %vm1426_vm0 = vmmov 0  }
  0x35   :  { %v73_v1 = vmul.f32 %v1476_v0, %v1476_v0  ;;  %1018 = vmatprep.subr.mxu0 %v1425_v2  ;;  %v102_v3 = vld [vmem:[#allocation5 + $0x78] sm:$0xff]  ;;  %1053 = vmatprep.subr.mxu1 %v1425_v2  ;;  %v100_v5 = vld [vmem:[#allocation5 + $0x68] sm:$0xff]  ;;  %v99_v6 = vld [vmem:[#allocation5 + $0x60] sm:$0xff]  ;;  %s1427_s26 = smov [#allocation10]  }
  0x36   :  { %1019 = vmatpush3.msra.mxu0 %v102_v3  ;;  %v98_v7 = vld [vmem:[#allocation5 + $0x58] sm:$0xff]  ;;  %v97_v8 = vld [vmem:[#allocation5 + $0x50] sm:$0xff]  ;;  %v96_v9 = vld [vmem:[#allocation5 + $0x48] sm:$0xff]  ;;  %1050 = vmatprep.mubr.msk.f32.mxu0 %vm1426_vm0, %v1425_v2  ;;  %s857_s27 = sshll.u32 %s1427_s26, 4  ;;  %s858_s27 = int_to_ptr.vmem [resolvable:$true] %s857_s27 }
  0x37   :  { %74 = vadd.xlane.f32.xlu0 %v73_v1  ;;  %1020 = vmatprep.subr.mxu0 %v1425_v2  ;;  %v95_v10 = vld [vmem:[#allocation5 + $0x40] sm:$0xff]  ;;  %v94_v11 = vld [vmem:[#allocation5 + $0x38] sm:$0xff]  ;;  %v93_v12 = vld [vmem:[#allocation5 + $0x30] sm:$0xff]  ;;  %s1391_s28 = scalar_lea.vmem %s858_s27, 128  ;;  %p1396_p7 = scmp.lt.s32.totalorder %s858_s27, %s858_s27 }
  0x38   :  { %1021 = vmatpush3.msra.mxu0 %v101_v4  ;;  %1085 = vmatprep.mubr.msk.f32.mxu1 %vm1426_vm0, %v1425_v2  ;;  %v92_v13 = vld [vmem:[#allocation5 + $0x28] sm:$0xff]  ;;  %v91_v14 = vld [vmem:[#allocation5 + $0x20] sm:$0xff]  ;;  %v90_v15 = vld [vmem:[#allocation5 + $0x18] sm:$0xff]  ;;  %p1392_p6 = scmp.ne.s32.totalorder %s858_s27, %s1391_s28  ;;  %p1397_p8 = scmp.lt.s32.totalorder %s1391_s28, %s1391_s28 }
  0x39   :  { %1022 = vmatprep.subr.mxu0 %v1425_v2  ;;  %v89_v16 = vld [vmem:[#allocation5 + $0x10] sm:$0xff]  ;;  %v88_v17 = vld [vmem:[#allocation5 + $0x8] sm:$0xff]  ;;  %v87_v18 = vld [vmem:[#allocation5] sm:$0xff] }
  0x3a   :  { %1023 = vmatpush3.msra.mxu0 %v100_v5  ;;  %v196_v19 = vld [vmem:[#allocation8 + $0x78] sm:$0xff]  ;;  %v195_v20 = vld [vmem:[#allocation8 + $0x70] sm:$0xff]  ;;  %v194_v21 = vld [vmem:[#allocation8 + $0x68] sm:$0xff]  ;;  %p1398_p9 = por %p1397_p8, %p1396_p7 }
  0x3b   :  { %1024 = vmatprep.subr.mxu0 %v1425_v2  ;;  %1054 = vmatpush3.msra.mxu1 %v196_v19  ;;  %v193_v22 = vld [vmem:[#allocation8 + $0x60] sm:$0xff]  ;;  %v192_v23 = vld [vmem:[#allocation8 + $0x58] sm:$0xff]  ;;  %v191_v24 = vld [vmem:[#allocation8 + $0x50] sm:$0xff] }
  0x3c   :  { %1025 = vmatpush3.msra.mxu0 %v99_v6  ;;  %1055 = vmatprep.subr.mxu1 %v1425_v2  ;;  %v190_v25 = vld [vmem:[#allocation8 + $0x48] sm:$0xff]  ;;  %v189_v26 = vld [vmem:[#allocation8 + $0x40] sm:$0xff]  ;;  %v188_v27 = vld [vmem:[#allocation8 + $0x38] sm:$0xff]  ;;  %p1399_p10 = pnand %p1398_p9, %p1392_p6 }
  0x3d   :  { %1026 = vmatprep.subr.mxu0 %v1425_v2  ;;  %1056 = vmatpush3.msra.mxu1 %v195_v20  ;;  %v187_v28 = vld [vmem:[#allocation8 + $0x30] sm:$0xff]  ;;  %v186_v29 = vld [vmem:[#allocation8 + $0x28] sm:$0xff]  ;;  %v185_v30 = vld [vmem:[#allocation8 + $0x20] sm:$0xff] }
  0x3e   :  { %1027 = vmatpush3.msra.mxu0 %v98_v7  ;;  %1057 = vmatprep.subr.mxu1 %v1425_v2  ;;  %v184_v31 = vld [vmem:[#allocation8 + $0x18] sm:$0xff]  ;;  %v183_v42 = vld [vmem:[#allocation8 + $0x10] sm:$0xff]  ;;  %v182_v43 = vld [vmem:[#allocation8 + $0x8] sm:$0xff] }
  0x3f   :  { %1028 = vmatprep.subr.mxu0 %v1425_v2  ;;  %1058 = vmatpush3.msra.mxu1 %v194_v21  ;;  %v181_v44 = vld [vmem:[#allocation8] sm:$0xff]  ;;  %v291_v45 = vld [vmem:[#allocation8 + $0xf8] sm:$0xff]  ;;  %v290_v46 = vld [vmem:[#allocation8 + $0xf0] sm:$0xff] }
  0x40   :  { %1029 = vmatpush3.msra.mxu0 %v97_v8  ;;  %1059 = vmatprep.subr.mxu1 %v1425_v2  ;;  %v289_v47 = vld [vmem:[#allocation8 + $0xe8] sm:$0xff]  ;;  %v288_v48 = vld [vmem:[#allocation8 + $0xe0] sm:$0xff]  ;;  %v287_v49 = vld [vmem:[#allocation8 + $0xd8] sm:$0xff] }
  0x41   :  { %1030 = vmatprep.subr.mxu0 %v1425_v2  ;;  %1060 = vmatpush3.msra.mxu1 %v193_v22  ;;  %v286_v50 = vld [vmem:[#allocation8 + $0xd0] sm:$0xff]  ;;  %v285_v51 = vld [vmem:[#allocation8 + $0xc8] sm:$0xff]  ;;  %v284_v52 = vld [vmem:[#allocation8 + $0xc0] sm:$0xff] }
  0x42   :  { %1031 = vmatpush3.msra.mxu0 %v96_v9  ;;  %1061 = vmatprep.subr.mxu1 %v1425_v2  ;;  %v283_v53 = vld [vmem:[#allocation8 + $0xb8] sm:$0xff]  ;;  %v282_v54 = vld [vmem:[#allocation8 + $0xb0] sm:$0xff]  ;;  %v281_v55 = vld [vmem:[#allocation8 + $0xa8] sm:$0xff] }
  0x43   :  { %1032 = vmatprep.subr.mxu0 %v1425_v2  ;;  %1062 = vmatpush3.msra.mxu1 %v192_v23  ;;  %v280_v56 = vld [vmem:[#allocation8 + $0xa0] sm:$0xff]  ;;  %v279_v57 = vld [vmem:[#allocation8 + $0x98] sm:$0xff]  ;;  %v278_v63 = vld [vmem:[#allocation8 + $0x90] sm:$0xff] }
  0x44   :  { %1033 = vmatpush3.msra.mxu0 %v95_v10  ;;  %1063 = vmatprep.subr.mxu1 %v1425_v2  ;;  %v868_v58 = vld [vmem:[#allocation7] ss:$0 sm:$0xff]  ;;  %v276_v1 = vld [vmem:[#allocation8 + $0x80] sm:$0xff]  ;;  %v386_v4 = vld [vmem:[#allocation8 + $0x170] sm:$0xff] }
  0x45   :  { %1034 = vmatprep.subr.mxu0 %v1425_v2  ;;  %1064 = vmatpush3.msra.mxu1 %v191_v24  ;;  %v387_v3 = vld [vmem:[#allocation8 + $0x178] sm:$0xff]  ;;  %v385_v5 = vld [vmem:[#allocation8 + $0x168] sm:$0xff]  ;;  %v384_v6 = vld [vmem:[#allocation8 + $0x160] sm:$0xff] }
  0x46   :  { %1035 = vmatpush3.msra.mxu0 %v94_v11  ;;  %1065 = vmatprep.subr.mxu1 %v1425_v2  ;;  %v383_v7 = vld [vmem:[#allocation8 + $0x158] sm:$0xff]  ;;  %v382_v8 = vld [vmem:[#allocation8 + $0x150] sm:$0xff]  ;;  %v381_v9 = vld [vmem:[#allocation8 + $0x148] sm:$0xff] }
  0x47   :  { %1036 = vmatprep.subr.mxu0 %v1425_v2  ;;  %1066 = vmatpush3.msra.mxu1 %v190_v25  ;;  %v380_v10 = vld [vmem:[#allocation8 + $0x140] sm:$0xff]  ;;  %v379_v11 = vld [vmem:[#allocation8 + $0x138] sm:$0xff]  ;;  %v374_v21 = vld [vmem:[#allocation8 + $0x110] sm:$0xff] }
  0x48   :  { %1037 = vmatpush3.msra.mxu0 %v93_v12  ;;  %1067 = vmatprep.subr.mxu1 %v1425_v2  ;;  %v378_v12 = vld [vmem:[#allocation8 + $0x130] sm:$0xff]  ;;  %v373_v22 = vld [vmem:[#allocation8 + $0x108] sm:$0xff]  ;;  %v372_v23 = vld [vmem:[#allocation8 + $0x100] sm:$0xff] }
  0x49   :  { %1038 = vmatprep.subr.mxu0 %v1425_v2  ;;  %1068 = vmatpush3.msra.mxu1 %v189_v26  ;;  %v483_v24 = vld [vmem:[#allocation8 + $0x1f8] sm:$0xff]  ;;  %v482_v25 = vld [vmem:[#allocation8 + $0x1f0] sm:$0xff]  ;;  %v481_v26 = vld [vmem:[#allocation8 + $0x1e8] sm:$0xff] }
  0x4a   :  { %1039 = vmatpush3.msra.mxu0 %v92_v13  ;;  %1069 = vmatprep.subr.mxu1 %v1425_v2  ;;  %v377_v13 = vld [vmem:[#allocation8 + $0x128] sm:$0xff] }
  0x4b   :  { %1040 = vmatprep.subr.mxu0 %v1425_v2  ;;  %1070 = vmatpush3.msra.mxu1 %v188_v27  ;;  %v480_v27 = vld [vmem:[#allocation8 + $0x1e0] sm:$0xff] }
  0x4c   :  { %1041 = vmatpush3.msra.mxu0 %v91_v14  ;;  %1071 = vmatprep.subr.mxu1 %v1425_v2  ;;  %v376_v14 = vld [vmem:[#allocation8 + $0x120] sm:$0xff] }
  0x4d   :  { %1042 = vmatprep.subr.mxu0 %v1425_v2  ;;  %1072 = vmatpush3.msra.mxu1 %v187_v28  ;;  %v479_v28 = vld [vmem:[#allocation8 + $0x1d8] sm:$0xff] }
  0x4e   :  { %1043 = vmatpush3.msra.mxu0 %v90_v15  ;;  %1073 = vmatprep.subr.mxu1 %v1425_v2  ;;  %v375_v15 = vld [vmem:[#allocation8 + $0x118] sm:$0xff] }
  0x4f   :  { %1044 = vmatprep.subr.mxu0 %v1425_v2  ;;  %1074 = vmatpush3.msra.mxu1 %v186_v29  ;;  %v478_v29 = vld [vmem:[#allocation8 + $0x1d0] sm:$0xff] }
  0x50   :  { %1045 = vmatpush3.msra.mxu0 %v89_v16  ;;  %1075 = vmatprep.subr.mxu1 %v1425_v2  ;;  %v869_v16 = vld [vmem:[%s1653_s4] ss:$0 sm:$0xff] }
  0x51   :  { %1046 = vmatprep.subr.mxu0 %v1425_v2  ;;  %1076 = vmatpush3.msra.mxu1 %v185_v30  ;;  %v477_v30 = vld [vmem:[#allocation8 + $0x1c8] sm:$0xff] }
  0x52   :  { %1047 = vmatpush3.msra.mxu0 %v88_v17  ;;  %1077 = vmatprep.subr.mxu1 %v1425_v2 }
  0x53   :  { %1048 = vmatprep.subr.mxu0 %v1425_v2  ;;  %1078 = vmatpush3.msra.mxu1 %v184_v31  ;;  %v476_v31 = vld [vmem:[#allocation8 + $0x1c0] sm:$0xff] }
  0x54   :  { %1049 = vmatpush3.msra.mxu0 %v87_v18  ;;  %1079 = vmatprep.subr.mxu1 %v1425_v2 }
  0x55   :  { %1088 = vmatprep.subr.mxu0 %v1425_v2  ;;  %1080 = vmatpush3.msra.mxu1 %v183_v42  ;;  %v470_v42 = vld [vmem:[#allocation8 + $0x190] sm:$0xff] }
  0x56   :  { %1081 = vmatprep.subr.mxu1 %v1425_v2 }
  0x57   :  { %1082 = vmatpush3.msra.mxu1 %v182_v43  ;;  %v469_v43 = vld [vmem:[#allocation8 + $0x188] sm:$0xff] }
  0x58   :  { %1083 = vmatprep.subr.mxu1 %v1425_v2 }
  0x59   :  { %1084 = vmatpush3.msra.mxu1 %v181_v44  ;;  %v468_v44 = vld [vmem:[#allocation8 + $0x180] sm:$0xff] }
  0x5a   :  { %1123 = vmatprep.subr.mxu1 %v1425_v2 }
  0xc0   :  { %v75_v32 = vpop.xlane.xlu0 %74 }
  0xc1   :  { %v76_v33 = vmul.f32 0.015625, %v75_v32  ;;  %v475_v32 = vld [vmem:[#allocation8 + $0x1b8] sm:$0xff] }
  0xc3   :  { %v77_v34 = vadd.f32 1e-08, %v76_v33  ;;  %v474_v33 = vld [vmem:[#allocation8 + $0x1b0] sm:$0xff] }
  0xc5   :  { %1307 = vrsqrt.f32 %v77_v34  ;;  %vm80_vm1 = vcmp.eq.f32.partialorder %v77_v34, inf  ;;  %v83_v37 = vand.u32 2147483648, %v77_v34  ;;  %vm82_vm2 = vcmp.eq.f32.partialorder %v77_v34, 0.0 }
  0xd2   :  { %v1308_v35 = vpop.eup %1307 }
  0xd3   :  { %v79_v36 = vmul.f32 %v1308_v35, %v77_v34  ;;  %v472_v35 = vld [vmem:[#allocation8 + $0x1a0] sm:$0xff] }
  0xd5   :  { %v81_v38 = vsel %vm80_vm1, %v77_v34, %v79_v36  ;;  %v473_v34 = vld [vmem:[#allocation8 + $0x1a8] sm:$0xff]  ;;  %v471_v36 = vld [vmem:[#allocation8 + $0x198] sm:$0xff] }
  0xd6   :  { %v84_v39 = vsel %vm82_vm2, %v83_v37, %v81_v38  ;;  %v871_v37 = vld [vmem:[%s1653_s4 + $0x1] ss:$0 sm:$0xff] }
  0xd7   :  { %1309 = vrcp.f32 %v84_v39 }
  0xe4   :  { %v1310_v40 = vpop.eup %1309 }
  0xe5   :  { %v86_v41 = vmul.f32 %v1310_v40, %v1476_v0  ;;  %v277_v0 = vld [vmem:[#allocation8 + $0x88] sm:$0xff] }
  0xe7   :  { %1051 = vmatmul.mubr.f32.vlgmr.msra.gmra.mxu0 %v86_v41 }
  0xe8   :  { %1120 = vmatprep.mubr.msk.f32.mxu0 %vm1426_vm0, %v1425_v2  ;;  %1089 = vmatpush3.msra.mxu0 %v291_v45  ;;  %v579_v45 = vld [vmem:[#allocation8 + $0x278] sm:$0xff] }
  0xe9   :  { %1090 = vmatprep.subr.mxu0 %v1425_v2 }
  0xea   :  { %1091 = vmatpush3.msra.mxu0 %v290_v46  ;;  %v578_v46 = vld [vmem:[#allocation8 + $0x270] sm:$0xff] }
  0xeb   :  { %1092 = vmatprep.subr.mxu0 %v1425_v2 }
  0xec   :  { %1093 = vmatpush3.msra.mxu0 %v289_v47  ;;  %v577_v47 = vld [vmem:[#allocation8 + $0x268] sm:$0xff] }
  0xed   :  { %1094 = vmatprep.subr.mxu0 %v1425_v2 }
  0xee   :  { %1095 = vmatpush3.msra.mxu0 %v288_v48  ;;  %v576_v48 = vld [vmem:[#allocation8 + $0x260] sm:$0xff] }
  0xef   :  { %1096 = vmatprep.subr.mxu0 %v1425_v2 }
  0xf0   :  { %1097 = vmatpush3.msra.mxu0 %v287_v49  ;;  %v575_v49 = vld [vmem:[#allocation8 + $0x258] sm:$0xff] }
  0xf1   :  { %1098 = vmatprep.subr.mxu0 %v1425_v2 }
  0xf2   :  { %1099 = vmatpush3.msra.mxu0 %v286_v50  ;;  %v574_v50 = vld [vmem:[#allocation8 + $0x250] sm:$0xff] }
  0xf3   :  { %1100 = vmatprep.subr.mxu0 %v1425_v2 }
  0xf4   :  { %1101 = vmatpush3.msra.mxu0 %v285_v51  ;;  %v573_v51 = vld [vmem:[#allocation8 + $0x248] sm:$0xff] }
  0xf5   :  { %1102 = vmatprep.subr.mxu0 %v1425_v2 }
  0xf6   :  { %1103 = vmatpush3.msra.mxu0 %v284_v52  ;;  %v572_v52 = vld [vmem:[#allocation8 + $0x240] sm:$0xff] }
  0xf7   :  { %1104 = vmatprep.subr.mxu0 %v1425_v2 }
  0xf8   :  { %1105 = vmatpush3.msra.mxu0 %v283_v53  ;;  %v571_v53 = vld [vmem:[#allocation8 + $0x238] sm:$0xff] }
  0xf9   :  { %1106 = vmatprep.subr.mxu0 %v1425_v2 }
  0xfa   :  { %1107 = vmatpush3.msra.mxu0 %v282_v54  ;;  %v570_v54 = vld [vmem:[#allocation8 + $0x230] sm:$0xff] }
  0xfb   :  { %1108 = vmatprep.subr.mxu0 %v1425_v2 }
  0xfc   :  { %1109 = vmatpush3.msra.mxu0 %v281_v55  ;;  %v569_v55 = vld [vmem:[#allocation8 + $0x228] sm:$0xff] }
  0xfd   :  { %1110 = vmatprep.subr.mxu0 %v1425_v2 }
  0xfe   :  { %1111 = vmatpush3.msra.mxu0 %v280_v56  ;;  %v568_v56 = vld [vmem:[#allocation8 + $0x220] sm:$0xff] }
  0xff   :  { %1112 = vmatprep.subr.mxu0 %v1425_v2 }
 0x100   :  { %1113 = vmatpush3.msra.mxu0 %v279_v57  ;;  %v567_v57 = vld [vmem:[#allocation8 + $0x218] sm:$0xff] }
 0x101   :  { %1114 = vmatprep.subr.mxu0 %v1425_v2 }
 0x102   :  { %1115 = vmatpush3.msra.mxu0 %v278_v63  ;;  %v566_v63 = vld [vmem:[#allocation8 + $0x210] sm:$0xff] }
 0x103   :  { %1116 = vmatprep.subr.mxu0 %v1425_v2 }
 0x104   :  { %1117 = vmatpush3.msra.mxu0 %v277_v0  ;;  %v565_v0 = vld [vmem:[#allocation8 + $0x208] sm:$0xff] }
 0x105   :  { %1118 = vmatprep.subr.mxu0 %v1425_v2 }
 0x106   :  { %1119 = vmatpush3.msra.mxu0 %v276_v1  ;;  %v564_v1 = vld [vmem:[#allocation8 + $0x200] sm:$0xff] }
 0x107   :  { %1158 = vmatprep.subr.mxu0 %v1425_v2 }
 0x1a7   :  { %v176_v59 = vpop.f32.mrf.mxu0 }
 0x1a8   :  { %v177_v60 = vadd.f32 %v868_v58, %v176_v59  ;;  %v873_v58 = vld [vmem:[%s1653_s4 + $0x2] ss:$0 sm:$0xff] }
 0x1a9   :  { %v1052_v61 = vpop.f32.mrf.mxu0 }
 0x1aa   :  { %v180_v62 = vmax.f32 %v177_v60, 0.0 }
 0x1ac   :  { %1086 = vmatmul.mubr.f32.vlgmr.msra.gmra.mxu1 %v180_v62 }
 0x1ad   :  { %1155 = vmatprep.mubr.msk.f32.mxu1 %vm1426_vm0, %v1425_v2  ;;  %1124 = vmatpush3.msra.mxu1 %v387_v3  ;;  %v675_v3 = vld [vmem:[#allocation8 + $0x2f8] sm:$0xff] }
 0x1ae   :  { %1125 = vmatprep.subr.mxu1 %v1425_v2 }
 0x1af   :  { %1126 = vmatpush3.msra.mxu1 %v386_v4  ;;  %v674_v4 = vld [vmem:[#allocation8 + $0x2f0] sm:$0xff] }
 0x1b0   :  { %1127 = vmatprep.subr.mxu1 %v1425_v2 }
 0x1b1   :  { %1128 = vmatpush3.msra.mxu1 %v385_v5  ;;  %v673_v5 = vld [vmem:[#allocation8 + $0x2e8] sm:$0xff] }
 0x1b2   :  { %1129 = vmatprep.subr.mxu1 %v1425_v2 }
 0x1b3   :  { %1130 = vmatpush3.msra.mxu1 %v384_v6  ;;  %v672_v6 = vld [vmem:[#allocation8 + $0x2e0] sm:$0xff] }
 0x1b4   :  { %1131 = vmatprep.subr.mxu1 %v1425_v2 }
 0x1b5   :  { %1132 = vmatpush3.msra.mxu1 %v383_v7  ;;  %v671_v7 = vld [vmem:[#allocation8 + $0x2d8] sm:$0xff] }
 0x1b6   :  { %1133 = vmatprep.subr.mxu1 %v1425_v2 }
 0x1b7   :  { %1134 = vmatpush3.msra.mxu1 %v382_v8  ;;  %v670_v8 = vld [vmem:[#allocation8 + $0x2d0] sm:$0xff] }
 0x1b8   :  { %1135 = vmatprep.subr.mxu1 %v1425_v2 }
 0x1b9   :  { %1136 = vmatpush3.msra.mxu1 %v381_v9  ;;  %v669_v9 = vld [vmem:[#allocation8 + $0x2c8] sm:$0xff] }
 0x1ba   :  { %1137 = vmatprep.subr.mxu1 %v1425_v2 }
 0x1bb   :  { %1138 = vmatpush3.msra.mxu1 %v380_v10  ;;  %v668_v10 = vld [vmem:[#allocation8 + $0x2c0] sm:$0xff] }
 0x1bc   :  { %1139 = vmatprep.subr.mxu1 %v1425_v2 }
 0x1bd   :  { %1140 = vmatpush3.msra.mxu1 %v379_v11  ;;  %v667_v11 = vld [vmem:[#allocation8 + $0x2b8] sm:$0xff] }
 0x1be   :  { %1141 = vmatprep.subr.mxu1 %v1425_v2 }
 0x1bf   :  { %1142 = vmatpush3.msra.mxu1 %v378_v12  ;;  %v666_v12 = vld [vmem:[#allocation8 + $0x2b0] sm:$0xff] }
 0x1c0   :  { %1143 = vmatprep.subr.mxu1 %v1425_v2 }
 0x1c1   :  { %1144 = vmatpush3.msra.mxu1 %v377_v13  ;;  %v665_v13 = vld [vmem:[#allocation8 + $0x2a8] sm:$0xff] }
 0x1c2   :  { %1145 = vmatprep.subr.mxu1 %v1425_v2 }
 0x1c3   :  { %1146 = vmatpush3.msra.mxu1 %v376_v14  ;;  %v664_v14 = vld [vmem:[#allocation8 + $0x2a0] sm:$0xff] }
 0x1c4   :  { %1147 = vmatprep.subr.mxu1 %v1425_v2 }
 0x1c5   :  { %1148 = vmatpush3.msra.mxu1 %v375_v15  ;;  %v663_v15 = vld [vmem:[#allocation8 + $0x298] sm:$0xff] }
 0x1c6   :  { %1149 = vmatprep.subr.mxu1 %v1425_v2 }
 0x1c7   :  { %1150 = vmatpush3.msra.mxu1 %v374_v21  ;;  %v662_v21 = vld [vmem:[#allocation8 + $0x290] sm:$0xff] }
 0x1c8   :  { %1151 = vmatprep.subr.mxu1 %v1425_v2 }
 0x1c9   :  { %1152 = vmatpush3.msra.mxu1 %v373_v22  ;;  %v661_v22 = vld [vmem:[#allocation8 + $0x288] sm:$0xff] }
 0x1ca   :  { %1153 = vmatprep.subr.mxu1 %v1425_v2 }
 0x1cb   :  { %1154 = vmatpush3.msra.mxu1 %v372_v23  ;;  %v660_v23 = vld [vmem:[#allocation8 + $0x280] sm:$0xff] }
 0x1cc   :  { %1193 = vmatprep.subr.mxu1 %v1425_v2 }
 0x26c   :  { %v270_v17 = vpop.f32.mrf.mxu1 }
 0x26d   :  { %v271_v18 = vadd.f32 %v869_v16, %v270_v17  ;;  %v875_v16 = vld [vmem:[%s1653_s4 + $0x3] ss:$0 sm:$0xff] }
 0x26e   :  { %v1087_v19 = vpop.f32.mrf.mxu1 }
 0x26f   :  { %v274_v20 = vmax.f32 %v271_v18, 0.0 }
 0x271   :  { %1121 = vmatmul.mubr.f32.vlgmr.msra.gmra.mxu0 %v274_v20 }
 0x272   :  { %1190 = vmatprep.mubr.msk.f32.mxu0 %vm1426_vm0, %v1425_v2  ;;  %1159 = vmatpush3.msra.mxu0 %v483_v24  ;;  %v771_v24 = vld [vmem:[#allocation8 + $0x378] sm:$0xff] }
 0x273   :  { %1160 = vmatprep.subr.mxu0 %v1425_v2 }
 0x274   :  { %1161 = vmatpush3.msra.mxu0 %v482_v25  ;;  %v770_v25 = vld [vmem:[#allocation8 + $0x370] sm:$0xff] }
 0x275   :  { %1162 = vmatprep.subr.mxu0 %v1425_v2 }
 0x276   :  { %1163 = vmatpush3.msra.mxu0 %v481_v26  ;;  %v769_v26 = vld [vmem:[#allocation8 + $0x368] sm:$0xff] }
 0x277   :  { %1164 = vmatprep.subr.mxu0 %v1425_v2 }
 0x278   :  { %1165 = vmatpush3.msra.mxu0 %v480_v27  ;;  %v768_v27 = vld [vmem:[#allocation8 + $0x360] sm:$0xff] }
 0x279   :  { %1166 = vmatprep.subr.mxu0 %v1425_v2 }
 0x27a   :  { %1167 = vmatpush3.msra.mxu0 %v479_v28  ;;  %v767_v28 = vld [vmem:[#allocation8 + $0x358] sm:$0xff] }
 0x27b   :  { %1168 = vmatprep.subr.mxu0 %v1425_v2 }
 0x27c   :  { %1169 = vmatpush3.msra.mxu0 %v478_v29  ;;  %v766_v29 = vld [vmem:[#allocation8 + $0x350] sm:$0xff] }
 0x27d   :  { %1170 = vmatprep.subr.mxu0 %v1425_v2 }
 0x27e   :  { %1171 = vmatpush3.msra.mxu0 %v477_v30  ;;  %v765_v30 = vld [vmem:[#allocation8 + $0x348] sm:$0xff] }
 0x27f   :  { %1172 = vmatprep.subr.mxu0 %v1425_v2 }
 0x280   :  { %1173 = vmatpush3.msra.mxu0 %v476_v31  ;;  %v764_v31 = vld [vmem:[#allocation8 + $0x340] sm:$0xff] }
 0x281   :  { %1174 = vmatprep.subr.mxu0 %v1425_v2 }
 0x282   :  { %1175 = vmatpush3.msra.mxu0 %v475_v32  ;;  %v763_v32 = vld [vmem:[#allocation8 + $0x338] sm:$0xff] }
 0x283   :  { %1176 = vmatprep.subr.mxu0 %v1425_v2 }
 0x284   :  { %1177 = vmatpush3.msra.mxu0 %v474_v33  ;;  %v762_v33 = vld [vmem:[#allocation8 + $0x330] sm:$0xff] }
 0x285   :  { %1178 = vmatprep.subr.mxu0 %v1425_v2 }
 0x286   :  { %1179 = vmatpush3.msra.mxu0 %v473_v34  ;;  %v761_v34 = vld [vmem:[#allocation8 + $0x328] sm:$0xff] }
 0x287   :  { %1180 = vmatprep.subr.mxu0 %v1425_v2 }
 0x288   :  { %1181 = vmatpush3.msra.mxu0 %v472_v35  ;;  %v760_v35 = vld [vmem:[#allocation8 + $0x320] sm:$0xff] }
 0x289   :  { %1182 = vmatprep.subr.mxu0 %v1425_v2 }
 0x28a   :  { %1183 = vmatpush3.msra.mxu0 %v471_v36  ;;  %v759_v36 = vld [vmem:[#allocation8 + $0x318] sm:$0xff] }
 0x28b   :  { %1184 = vmatprep.subr.mxu0 %v1425_v2 }
 0x28c   :  { %1185 = vmatpush3.msra.mxu0 %v470_v42  ;;  %v758_v42 = vld [vmem:[#allocation8 + $0x310] sm:$0xff] }
 0x28d   :  { %1186 = vmatprep.subr.mxu0 %v1425_v2 }
 0x28e   :  { %1187 = vmatpush3.msra.mxu0 %v469_v43  ;;  %v757_v43 = vld [vmem:[#allocation8 + $0x308] sm:$0xff] }
 0x28f   :  { %1188 = vmatprep.subr.mxu0 %v1425_v2 }
 0x290   :  { %1189 = vmatpush3.msra.mxu0 %v468_v44  ;;  %v756_v44 = vld [vmem:[#allocation8 + $0x300] sm:$0xff] }
 0x291   :  { %1228 = vmatprep.subr.mxu0 %v1425_v2 }
 0x331   :  { %v366_v38 = vpop.f32.mrf.mxu0 }
 0x332   :  { %v367_v39 = vadd.f32 %v871_v37, %v366_v38  ;;  %v877_v37 = vld [vmem:[%s1653_s4 + $0x4] ss:$0 sm:$0xff] }
 0x333   :  { %v1122_v40 = vpop.f32.mrf.mxu0 }
 0x334   :  { %v370_v41 = vmax.f32 %v367_v39, 0.0 }
 0x336   :  { %1156 = vmatmul.mubr.f32.vlgmr.msra.gmra.mxu1 %v370_v41 }
 0x337   :  { %1225 = vmatprep.mubr.msk.f32.mxu1 %vm1426_vm0, %v1425_v2  ;;  %1194 = vmatpush3.msra.mxu1 %v579_v45  ;;  %v879_v45 = vld [vmem:[%s1653_s4 + $0x5] ss:$0 sm:$0xff] }
 0x338   :  { %1195 = vmatprep.subr.mxu1 %v1425_v2 }
 0x339   :  { %1196 = vmatpush3.msra.mxu1 %v578_v46 }
 0x33a   :  { %1197 = vmatprep.subr.mxu1 %v1425_v2 }
 0x33b   :  { %1198 = vmatpush3.msra.mxu1 %v577_v47 }
 0x33c   :  { %1199 = vmatprep.subr.mxu1 %v1425_v2 }
 0x33d   :  { %1200 = vmatpush3.msra.mxu1 %v576_v48 }
 0x33e   :  { %1201 = vmatprep.subr.mxu1 %v1425_v2 }
 0x33f   :  { %1202 = vmatpush3.msra.mxu1 %v575_v49 }
 0x340   :  { %1203 = vmatprep.subr.mxu1 %v1425_v2 }
 0x341   :  { %1204 = vmatpush3.msra.mxu1 %v574_v50  ;;  %v881_v50 = vld [vmem:[%s1653_s4 + $0x6] ss:$0 sm:$0xff] }
 0x342   :  { %1205 = vmatprep.subr.mxu1 %v1425_v2 }
 0x343   :  { %1206 = vmatpush3.msra.mxu1 %v573_v51 }
 0x344   :  { %1207 = vmatprep.subr.mxu1 %v1425_v2 }
 0x345   :  { %1208 = vmatpush3.msra.mxu1 %v572_v52 }
 0x346   :  { %1209 = vmatprep.subr.mxu1 %v1425_v2 }
 0x347   :  { %1210 = vmatpush3.msra.mxu1 %v571_v53 }
 0x348   :  { %1211 = vmatprep.subr.mxu1 %v1425_v2 }
 0x349   :  { %1212 = vmatpush3.msra.mxu1 %v570_v54 }
 0x34a   :  { %1213 = vmatprep.subr.mxu1 %v1425_v2 }
 0x34b   :  { %1214 = vmatpush3.msra.mxu1 %v569_v55 }
 0x34c   :  { %1215 = vmatprep.subr.mxu1 %v1425_v2 }
 0x34d   :  { %1216 = vmatpush3.msra.mxu1 %v568_v56 }
 0x34e   :  { %1217 = vmatprep.subr.mxu1 %v1425_v2 }
 0x34f   :  { %1218 = vmatpush3.msra.mxu1 %v567_v57 }
 0x350   :  { %1219 = vmatprep.subr.mxu1 %v1425_v2 }
 0x351   :  { %1220 = vmatpush3.msra.mxu1 %v566_v63 }
 0x352   :  { %1221 = vmatprep.subr.mxu1 %v1425_v2 }
 0x353   :  { %1222 = vmatpush3.msra.mxu1 %v565_v0 }
 0x354   :  { %1223 = vmatprep.subr.mxu1 %v1425_v2 }
 0x355   :  { %1224 = vmatpush3.msra.mxu1 %v564_v1 }
 0x356   :  { %1263 = vmatprep.subr.mxu1 %v1425_v2 }
 0x3f6   :  { %v462_v59 = vpop.f32.mrf.mxu1 }
 0x3f7   :  { %v463_v60 = vadd.f32 %v873_v58, %v462_v59 }
 0x3f8   :  { %v1157_v61 = vpop.f32.mrf.mxu1 }
 0x3f9   :  { %v466_v62 = vmax.f32 %v463_v60, 0.0 }
 0x3fb   :  { %1191 = vmatmul.mubr.f32.vlgmr.msra.gmra.mxu0 %v466_v62 }
 0x3fc   :  { %1260 = vmatprep.mubr.msk.f32.mxu0 %vm1426_vm0, %v1425_v2  ;;  %1229 = vmatpush3.msra.mxu0 %v675_v3 }
 0x3fd   :  { %1230 = vmatprep.subr.mxu0 %v1425_v2 }
 0x3fe   :  { %1231 = vmatpush3.msra.mxu0 %v674_v4 }
 0x3ff   :  { %1232 = vmatprep.subr.mxu0 %v1425_v2 }
 0x400   :  { %1233 = vmatpush3.msra.mxu0 %v673_v5 }
 0x401   :  { %1234 = vmatprep.subr.mxu0 %v1425_v2 }
 0x402   :  { %1235 = vmatpush3.msra.mxu0 %v672_v6 }
 0x403   :  { %1236 = vmatprep.subr.mxu0 %v1425_v2 }
 0x404   :  { %1237 = vmatpush3.msra.mxu0 %v671_v7 }
 0x405   :  { %1238 = vmatprep.subr.mxu0 %v1425_v2 }
 0x406   :  { %1239 = vmatpush3.msra.mxu0 %v670_v8 }
 0x407   :  { %1240 = vmatprep.subr.mxu0 %v1425_v2 }
 0x408   :  { %1241 = vmatpush3.msra.mxu0 %v669_v9 }
 0x409   :  { %1242 = vmatprep.subr.mxu0 %v1425_v2 }
 0x40a   :  { %1243 = vmatpush3.msra.mxu0 %v668_v10 }
 0x40b   :  { %1244 = vmatprep.subr.mxu0 %v1425_v2 }
 0x40c   :  { %1245 = vmatpush3.msra.mxu0 %v667_v11 }
 0x40d   :  { %1246 = vmatprep.subr.mxu0 %v1425_v2 }
 0x40e   :  { %1247 = vmatpush3.msra.mxu0 %v666_v12 }
 0x40f   :  { %1248 = vmatprep.subr.mxu0 %v1425_v2 }
 0x410   :  { %1249 = vmatpush3.msra.mxu0 %v665_v13 }
 0x411   :  { %1250 = vmatprep.subr.mxu0 %v1425_v2 }
 0x412   :  { %1251 = vmatpush3.msra.mxu0 %v664_v14 }
 0x413   :  { %1252 = vmatprep.subr.mxu0 %v1425_v2 }
 0x414   :  { %1253 = vmatpush3.msra.mxu0 %v663_v15 }
 0x415   :  { %1254 = vmatprep.subr.mxu0 %v1425_v2 }
 0x416   :  { %1255 = vmatpush3.msra.mxu0 %v662_v21 }
 0x417   :  { %1256 = vmatprep.subr.mxu0 %v1425_v2 }
 0x418   :  { %1257 = vmatpush3.msra.mxu0 %v661_v22 }
 0x419   :  { %1258 = vmatprep.subr.mxu0 %v1425_v2 }
 0x41a   :  { %1259 = vmatpush3.msra.mxu0 %v660_v23 }
 0x4bb   :  { %v558_v17 = vpop.f32.mrf.mxu0 }
 0x4bc   :  { %v559_v18 = vadd.f32 %v875_v16, %v558_v17 }
 0x4bd   :  { %v1192_v19 = vpop.f32.mrf.mxu0 }
 0x4be   :  { %v562_v20 = vmax.f32 %v559_v18, 0.0 }
 0x4c0   :  { %1226 = vmatmul.mubr.f32.vlgmr.msra.gmra.mxu1 %v562_v20 }
 0x4c1   :  { %1295 = vmatprep.mubr.msk.f32.mxu1 %vm1426_vm0, %v1425_v2  ;;  %1264 = vmatpush3.msra.mxu1 %v771_v24 }
 0x4c2   :  { %1265 = vmatprep.subr.mxu1 %v1425_v2 }
 0x4c3   :  { %1266 = vmatpush3.msra.mxu1 %v770_v25 }
 0x4c4   :  { %1267 = vmatprep.subr.mxu1 %v1425_v2 }
 0x4c5   :  { %1268 = vmatpush3.msra.mxu1 %v769_v26 }
 0x4c6   :  { %1269 = vmatprep.subr.mxu1 %v1425_v2 }
 0x4c7   :  { %1270 = vmatpush3.msra.mxu1 %v768_v27 }
 0x4c8   :  { %1271 = vmatprep.subr.mxu1 %v1425_v2 }
 0x4c9   :  { %1272 = vmatpush3.msra.mxu1 %v767_v28 }
 0x4ca   :  { %1273 = vmatprep.subr.mxu1 %v1425_v2 }
 0x4cb   :  { %1274 = vmatpush3.msra.mxu1 %v766_v29 }
 0x4cc   :  { %1275 = vmatprep.subr.mxu1 %v1425_v2 }
 0x4cd   :  { %1276 = vmatpush3.msra.mxu1 %v765_v30 }
 0x4ce   :  { %1277 = vmatprep.subr.mxu1 %v1425_v2 }
 0x4cf   :  { %1278 = vmatpush3.msra.mxu1 %v764_v31 }
 0x4d0   :  { %1279 = vmatprep.subr.mxu1 %v1425_v2 }
 0x4d1   :  { %1280 = vmatpush3.msra.mxu1 %v763_v32 }
 0x4d2   :  { %1281 = vmatprep.subr.mxu1 %v1425_v2 }
 0x4d3   :  { %1282 = vmatpush3.msra.mxu1 %v762_v33 }
 0x4d4   :  { %1283 = vmatprep.subr.mxu1 %v1425_v2 }
 0x4d5   :  { %1284 = vmatpush3.msra.mxu1 %v761_v34 }
 0x4d6   :  { %1285 = vmatprep.subr.mxu1 %v1425_v2 }
 0x4d7   :  { %1286 = vmatpush3.msra.mxu1 %v760_v35 }
 0x4d8   :  { %1287 = vmatprep.subr.mxu1 %v1425_v2 }
 0x4d9   :  { %1288 = vmatpush3.msra.mxu1 %v759_v36 }
 0x4da   :  { %1289 = vmatprep.subr.mxu1 %v1425_v2 }
 0x4db   :  { %1290 = vmatpush3.msra.mxu1 %v758_v42 }
 0x4dc   :  { %1291 = vmatprep.subr.mxu1 %v1425_v2 }
 0x4dd   :  { %1292 = vmatpush3.msra.mxu1 %v757_v43 }
 0x4de   :  { %1293 = vmatprep.subr.mxu1 %v1425_v2 }
 0x4df   :  { %1294 = vmatpush3.msra.mxu1 %v756_v44 }
 0x580   :  { %v654_v38 = vpop.f32.mrf.mxu1 }
 0x581   :  { %v655_v39 = vadd.f32 %v877_v37, %v654_v38 }
 0x582   :  { %v1227_v40 = vpop.f32.mrf.mxu1 }
 0x583   :  { %v658_v41 = vmax.f32 %v655_v39, 0.0 }
 0x585   :  { %1261 = vmatmul.mubr.f32.vlgmr.msra.gmra.mxu0 %v658_v41 }
 0x645   :  { %v750_v46 = vpop.f32.mrf.mxu0 }
 0x646   :  { %v751_v47 = vadd.f32 %v879_v45, %v750_v46 }
 0x647   :  { %v1262_v48 = vpop.f32.mrf.mxu0 }
 0x648   :  { %v754_v49 = vmax.f32 %v751_v47, 0.0 }
 0x64a   :  { %1296 = vmatmul.mubr.f32.vlgmr.msra.gmra.mxu1 %v754_v49 }
 0x70a   :  { %v846_v51 = vpop.f32.mrf.mxu1 }
 0x70b   :  { %v847_v52 = vadd.f32 %v881_v50, %v846_v51 }
 0x70c   :  { %v1297_v2 = vpop.f32.mrf.mxu1 }
 0x70d   :  { %850 = vst [vmem:[#allocation10] sm:$0xff] %v847_v52 }
 0x70e   :  { %1402 = shalt.err (!%p1399_p10)
}
 0x70f   :  { %860 = dma.vmem_to_hbm [thread:$0]  %s858_s27, 128, %s1654_s5, [#allocation4]  }
 0x710   :  { %1417 = dma.done.wait [#allocation4], 128  }
 0x711   :  { %1418 = vsyncadd [#allocation4], 4294967168 }
 0x712   :  { %864 = vsyncpa [#allocation3], 1 }
 0x713   :  { %865 = vsyncpa [#allocation6], 1 }
 0x714   :  { %866 = vsyncpa [#allocation9], 1 }
 0x715   :  { %867 = vsyncpa [#allocation4], 1 }

</bundles_post_ra>
